<compile_context>
chip_gen: v7x
topology: tpu7x:2x2x1
jax: 0.10.0
libtpu: 0.0.40
codegen_flags: <defaults>
</compile_context>

<pallas_src>
import functools
import math

import jax
import jax.numpy as jnp
from jax.experimental import pallas as pl
from jax.experimental.pallas import tpu as pltpu


def _modulated_conv2d_kernel(style_ref, wmod_ref, bmod_ref, w_ref, wsq_ref,
                             x_ref, mask_ref, out_ref, *, mod_scale,
                             conv_scale, demodulate, eps, K, W):
    KK, O, C = w_ref.shape
    HW = x_ref.shape[-1]
    p = K // 2

    # --- Style modulation (EqualLinear, activation=None), column oriented ---
    # s_col[c] = sum_s mod_w[c, s] * style[s] * mod_scale + bias[c]
    s_col = jax.lax.dot_general(
        wmod_ref[...], style_ref[0],
        dimension_numbers=(((1,), (1,)), ((), ())),
        preferred_element_type=jnp.float32) * mod_scale + bmod_ref[...]  # (C,1)

    # Fold the per-sample style into the input once (instead of rescaling the
    # weight per tap): conv(x, scale*W*s) == scale * conv(x*s, W).
    x_mod = x_ref[0] * s_col                                             # (C,HW)

    # --- Conv as K*K lane-rolled MXU matmuls (no im2col slab) ---------------
    acc = jnp.zeros((O, HW), jnp.float32)
    for k in range(KK):                       # K*K is small & static -> unrolled
        dy, dx = k // K - p, k % K - p
        delta = dy * W + dx                   # flat index offset of this tap
        if delta == 0:
            xk = x_mod                        # center tap: no shift, no border
        else:
            xk = pltpu.roll(x_mod, shift=(-delta) % HW, axis=1)   # XLU rotate
            xk = xk * mask_ref[k]             # zero the wrapped border (padding)
        acc = acc + jax.lax.dot_general(
            w_ref[k], xk,
            dimension_numbers=(((1,), (0,)), ((), ())),
            preferred_element_type=jnp.float32)                   # (O, HW)

    # --- Epilogue: fan-in scale (+ demodulation) as an (O, 1) gain ----------
    if demodulate:
        # sum_{ic,kh,kw} (scale*W*s)^2 = scale^2 * sum_ic s_ic^2 * sum_k W^2
        denom = jax.lax.dot_general(
            wsq_ref[...], s_col * s_col,
            dimension_numbers=(((1,), (0,)), ((), ())),
            preferred_element_type=jnp.float32)                   # (O, 1)
        gain = conv_scale * jax.lax.rsqrt(conv_scale * conv_scale * denom + eps)
        out = acc * gain                                          # lane-broadcast
    else:
        out = acc * conv_scale
    out_ref[0] = out.astype(out_ref.dtype)


def modulated_conv2d(x, style, conv_weight, mod_weight, mod_bias, *,
                     demodulate=True, lr_mul=1.0, eps=1e-8):
    """Pallas implementation of ModulatedConv2d.forward (upsample=False).

    x:           (B, C_in, H, W)        float32
    style:       (B, style_dim)         float32
    conv_weight: (1, C_out, C_in, K, K) float32   (module's self.weight)
    mod_weight:  (C_in, style_dim)      float32   (EqualLinear weight)
    mod_bias:    (C_in,)                float32   (EqualLinear bias)
    """
    B, C, H, W = x.shape
    O = conv_weight.shape[1]
    K = conv_weight.shape[-1]
    S = style.shape[-1]
    KK = K * K
    HW = H * W
    p = K // 2

    conv_scale = 1.0 / math.sqrt(C * K * K)
    mod_scale = 1.0 / math.sqrt(S) * lr_mul

    # ---- layout plumbing (tiny, XLA side, once per call) --------------------
    x_flat = x.reshape(B, C, HW)                           # single HBM copy of x
    w = conv_weight[0]                                     # (O, C, K, K)
    w_kk = w.reshape(O, C, KK).transpose(2, 0, 1)          # (K*K, O, C)
    wsq = jnp.sum(w * w, axis=(-2, -1))                    # (O, C), for demod
    bmod = (mod_bias * lr_mul).reshape(C, 1)               # bias*lr_mul folded
    style3 = style.reshape(B, 1, S)                        # per-sample blocks

    # Per-tap border masks reproducing zero padding for the flat lane roll.
    hh = jnp.arange(H)
    ww = jnp.arange(W)
    masks = []
    for ky in range(K):
        for kx in range(K):
            dy, dx = ky - p, kx - p
            mh = (hh + dy >= 0) & (hh + dy < H)            # (H,)
            mw = (ww + dx >= 0) & (ww + dx < W)            # (W,)
            masks.append((mh[:, None] & mw[None, :]).reshape(HW))
    masks = jnp.stack(masks).astype(x.dtype).reshape(KK, 1, HW)

    kernel = functools.partial(
        _modulated_conv2d_kernel,
        mod_scale=mod_scale,
        conv_scale=conv_scale,
        demodulate=demodulate,
        eps=eps,
        K=K,
        W=W,
    )

    out = pl.pallas_call(
        kernel,
        out_shape=jax.ShapeDtypeStruct((B, O, HW), x.dtype),
        grid=(B,),
        in_specs=[
            pl.BlockSpec((1, 1, S), lambda b: (b, 0, 0)),        # style (per b)
            pl.BlockSpec((C, S), lambda b: (0, 0)),              # mod weight
            pl.BlockSpec((C, 1), lambda b: (0, 0)),              # mod bias col
            pl.BlockSpec((KK, O, C), lambda b: (0, 0, 0)),       # conv weight
            pl.BlockSpec((O, C), lambda b: (0, 0)),              # sum_k W^2
            pl.BlockSpec((1, C, HW), lambda b: (b, 0, 0)),       # x (per b)
            pl.BlockSpec((KK, 1, HW), lambda b: (0, 0, 0)),      # border masks
        ],
        out_specs=pl.BlockSpec((1, O, HW), lambda b: (b, 0, 0)),
        compiler_params=pltpu.CompilerParams(
            dimension_semantics=("parallel",)),
        cost_estimate=pl.CostEstimate(
            flops=2 * B * O * C * KK * HW + 2 * B * C * S,
            transcendentals=B * O,
            bytes_accessed=4 * (B * C * HW + B * O * HW + KK * O * C + O * C
                                + B * S + C * S + C + KK * HW)),
    )(style3, mod_weight, bmod, w_kk, wsq, x_flat, masks)
    return out.reshape(B, O, H, W)


def modulated_conv2d_ref(x, style, conv_weight, mod_weight, mod_bias, *,
                         demodulate=True, lr_mul=1.0, eps=1e-8):
    """Pure-JAX reference mirroring the PyTorch forward (upsample=False)."""
    B, C, H, W = x.shape
    O = conv_weight.shape[1]
    K = conv_weight.shape[-1]
    S = style.shape[-1]
    p = K // 2
    mod_scale = 1.0 / math.sqrt(S) * lr_mul
    conv_scale = 1.0 / math.sqrt(C * K * K)

    s = style @ (mod_weight * mod_scale).T + (mod_bias * lr_mul)[None, :]  # (B, C)
    wgt = conv_scale * conv_weight * s.reshape(B, 1, C, 1, 1)              # (B,O,C,K,K)
    if demodulate:
        demod = jax.lax.rsqrt(jnp.sum(wgt * wgt, axis=(2, 3, 4)) + eps)
        wgt = wgt * demod.reshape(B, O, 1, 1, 1)
    wgt = wgt.reshape(B * O, C, K, K)
    xg = x.reshape(1, B * C, H, W)
    out = jax.lax.conv_general_dilated(
        xg, wgt, window_strides=(1, 1), padding=[(p, p), (p, p)],
        dimension_numbers=("NCHW", "OIHW", "NCHW"), feature_group_count=B)
    return out.reshape(B, O, H, W)


if __name__ == "__main__":
    key = jax.random.PRNGKey(0)
    k1, k2, k3, k4 = jax.random.split(key, 4)

    B, C_in, C_out, K, S, H, W = 2, 4, 8, 3, 32, 16, 16

    # Deterministic synthetic params mirroring the module's __init__:
    #   self.weight ~ randn(1, out, in, K, K)
    #   modulation = EqualLinear(style_dim, in_channel, bias_init=1, lr_mul=1)
    conv_w = jax.random.normal(k1, (1, C_out, C_in, K, K), jnp.float32)
    mod_w = jax.random.normal(k2, (C_in, S), jnp.float32)
    mod_b = jnp.ones((C_in,), jnp.float32)
    x = jax.random.normal(k3, (B, C_in, H, W), jnp.float32)
    style = jax.random.normal(k4, (B, S), jnp.float32)

    # Demodulated path (module default)
    out = modulated_conv2d(x, style, conv_w, mod_w, mod_b, demodulate=True)
    out = jax.block_until_ready(out)
    ref = modulated_conv2d_ref(x, style, conv_w, mod_w, mod_b, demodulate=True)

    # Non-demodulated path
    out_nd = modulated_conv2d(x, style, conv_w, mod_w, mod_b, demodulate=False)
    out_nd = jax.block_until_ready(out_nd)
    ref_nd = modulated_conv2d_ref(x, style, conv_w, mod_w, mod_b,
                                  demodulate=False)

    assert out.shape == (B, C_out, H, W)
    assert jnp.allclose(out, ref, atol=1e-3, rtol=1e-3), "demodulated mismatch"
    assert jnp.allclose(out_nd, ref_nd, atol=1e-3, rtol=1e-3), "modulated mismatch"

    print("KERNEL_OK")
</pallas_src>

<mosaic_0001>
module attributes {stable_mosaic.version = 11 : i64} {
  func.func @_modulated_conv2d_kernel(%arg0: i32, %arg1: memref<1x1x32xf32, #tpu.memory_space<vmem>>, %arg2: memref<4x32xf32, #tpu.memory_space<vmem>>, %arg3: memref<4x1xf32, #tpu.memory_space<vmem>>, %arg4: memref<9x8x4xf32, #tpu.memory_space<vmem>>, %arg5: memref<8x4xf32, #tpu.memory_space<vmem>>, %arg6: memref<1x4x256xf32, #tpu.memory_space<vmem>>, %arg7: memref<9x1x256xf32, #tpu.memory_space<vmem>>, %arg8: memref<1x8x256xf32, #tpu.memory_space<vmem>>) attributes {dimension_semantics = [#tpu.dimension_semantics<parallel>], iteration_bounds = array<i64: 2>, scalar_prefetch = 0 : i64, scratch_operands = 0 : i64, tpu.core_type = #tpu.core_type<tc>, window_params = [{transform_indices = @transform_0, window_bounds = array<i64: 1, 1, 32>}, {pipeline_mode = #tpu.pipeline_mode<synchronous>, transform_indices = @transform_1, window_bounds = array<i64: 4, 32>}, {pipeline_mode = #tpu.pipeline_mode<synchronous>, transform_indices = @transform_2, window_bounds = array<i64: 4, 1>}, {pipeline_mode = #tpu.pipeline_mode<synchronous>, transform_indices = @transform_3, window_bounds = array<i64: 9, 8, 4>}, {pipeline_mode = #tpu.pipeline_mode<synchronous>, transform_indices = @transform_4, window_bounds = array<i64: 8, 4>}, {transform_indices = @transform_5, window_bounds = array<i64: 1, 4, 256>}, {pipeline_mode = #tpu.pipeline_mode<synchronous>, transform_indices = @transform_6, window_bounds = array<i64: 9, 1, 256>}, {transform_indices = @transform_7, window_bounds = array<i64: 1, 8, 256>}]} {
    %c0 = arith.constant 0 : index
    %c0_0 = arith.constant 0 : index
    %0 = vector.load %arg2[%c0, %c0_0] : memref<4x32xf32, #tpu.memory_space<vmem>>, vector<4x32xf32>
    %c0_1 = arith.constant 0 : index
    %c0_2 = arith.constant 0 : index
    %c0_3 = arith.constant 0 : index
    %1 = vector.load %arg1[%c0_1, %c0_2, %c0_3] : memref<1x1x32xf32, #tpu.memory_space<vmem>>, vector<1x1x32xf32>
    %2 = vector.shape_cast %1 : vector<1x1x32xf32> to vector<1x32xf32>
    %cst = arith.constant dense<0.000000e+00> : vector<4x1xf32>
    %3 = tpu.matmul %0, %2, %cst {dimension_numbers = #tpu.dot_dimension_numbers<[1], [1], [0], [0], [0, 0, 1, 0], [], []>} : vector<4x32xf32>, vector<1x32xf32>, vector<4x1xf32> -> vector<4x1xf32>
    %cst_4 = arith.constant 0.176776692 : f32
    %4 = vector.broadcast %cst_4 : f32 to vector<4x1xf32>
    %5 = arith.mulf %3, %4 : vector<4x1xf32>
    %c0_5 = arith.constant 0 : index
    %c0_6 = arith.constant 0 : index
    %6 = vector.load %arg3[%c0_5, %c0_6] : memref<4x1xf32, #tpu.memory_space<vmem>>, vector<4x1xf32>
    %7 = arith.addf %5, %6 : vector<4x1xf32>
    %c0_7 = arith.constant 0 : index
    %c0_8 = arith.constant 0 : index
    %c0_9 = arith.constant 0 : index
    %8 = vector.load %arg6[%c0_7, %c0_8, %c0_9] : memref<1x4x256xf32, #tpu.memory_space<vmem>>, vector<1x4x256xf32>
    %9 = vector.shape_cast %8 : vector<1x4x256xf32> to vector<4x256xf32>
    %10 = vector.broadcast %7 : vector<4x1xf32> to vector<4x256xf32>
    %11 = arith.mulf %9, %10 : vector<4x256xf32>
    %cst_10 = arith.constant 0.000000e+00 : f32
    %12 = vector.broadcast %cst_10 : f32 to vector<8x256xf32>
    %c17_i32 = arith.constant 17 : i32
    %13 = tpu.dynamic_rotate %11 by %c17_i32 dim 1 : vector<4x256xf32>, i32 -> vector<4x256xf32>
    %c0_11 = arith.constant 0 : index
    %c0_12 = arith.constant 0 : index
    %c0_13 = arith.constant 0 : index
    %14 = vector.load %arg7[%c0_11, %c0_12, %c0_13] : memref<9x1x256xf32, #tpu.memory_space<vmem>>, vector<1x1x256xf32>
    %15 = vector.shape_cast %14 : vector<1x1x256xf32> to vector<1x256xf32>
    %16 = vector.broadcast %15 : vector<1x256xf32> to vector<4x256xf32>
    %17 = arith.mulf %13, %16 : vector<4x256xf32>
    %c0_14 = arith.constant 0 : index
    %c0_15 = arith.constant 0 : index
    %c0_16 = arith.constant 0 : index
    %18 = vector.load %arg4[%c0_14, %c0_15, %c0_16] : memref<9x8x4xf32, #tpu.memory_space<vmem>>, vector<1x8x4xf32>
    %19 = vector.shape_cast %18 : vector<1x8x4xf32> to vector<8x4xf32>
    %cst_17 = arith.constant dense<0.000000e+00> : vector<8x256xf32>
    %20 = tpu.matmul %19, %17, %cst_17 {dimension_numbers = #tpu.dot_dimension_numbers<[1], [0], [0], [1], [0, 0, 1, 1], [], []>} : vector<8x4xf32>, vector<4x256xf32>, vector<8x256xf32> -> vector<8x256xf32>
    %21 = arith.addf %12, %20 : vector<8x256xf32>
    %c16_i32 = arith.constant 16 : i32
    %22 = tpu.dynamic_rotate %11 by %c16_i32 dim 1 : vector<4x256xf32>, i32 -> vector<4x256xf32>
    %c1 = arith.constant 1 : index
    %c0_18 = arith.constant 0 : index
    %c0_19 = arith.constant 0 : index
    %23 = vector.load %arg7[%c1, %c0_18, %c0_19] : memref<9x1x256xf32, #tpu.memory_space<vmem>>, vector<1x1x256xf32>
    %24 = vector.shape_cast %23 : vector<1x1x256xf32> to vector<1x256xf32>
    %25 = vector.broadcast %24 : vector<1x256xf32> to vector<4x256xf32>
    %26 = arith.mulf %22, %25 : vector<4x256xf32>
    %c1_20 = arith.constant 1 : index
    %c0_21 = arith.constant 0 : index
    %c0_22 = arith.constant 0 : index
    %27 = vector.load %arg4[%c1_20, %c0_21, %c0_22] : memref<9x8x4xf32, #tpu.memory_space<vmem>>, vector<1x8x4xf32>
    %28 = vector.shape_cast %27 : vector<1x8x4xf32> to vector<8x4xf32>
    %cst_23 = arith.constant dense<0.000000e+00> : vector<8x256xf32>
    %29 = tpu.matmul %28, %26, %cst_23 {dimension_numbers = #tpu.dot_dimension_numbers<[1], [0], [0], [1], [0, 0, 1, 1], [], []>} : vector<8x4xf32>, vector<4x256xf32>, vector<8x256xf32> -> vector<8x256xf32>
    %30 = arith.addf %21, %29 : vector<8x256xf32>
    %c15_i32 = arith.constant 15 : i32
    %31 = tpu.dynamic_rotate %11 by %c15_i32 dim 1 : vector<4x256xf32>, i32 -> vector<4x256xf32>
    %c2 = arith.constant 2 : index
    %c0_24 = arith.constant 0 : index
    %c0_25 = arith.constant 0 : index
    %32 = vector.load %arg7[%c2, %c0_24, %c0_25] : memref<9x1x256xf32, #tpu.memory_space<vmem>>, vector<1x1x256xf32>
    %33 = vector.shape_cast %32 : vector<1x1x256xf32> to vector<1x256xf32>
    %34 = vector.broadcast %33 : vector<1x256xf32> to vector<4x256xf32>
    %35 = arith.mulf %31, %34 : vector<4x256xf32>
    %c2_26 = arith.constant 2 : index
    %c0_27 = arith.constant 0 : index
    %c0_28 = arith.constant 0 : index
    %36 = vector.load %arg4[%c2_26, %c0_27, %c0_28] : memref<9x8x4xf32, #tpu.memory_space<vmem>>, vector<1x8x4xf32>
    %37 = vector.shape_cast %36 : vector<1x8x4xf32> to vector<8x4xf32>
    %cst_29 = arith.constant dense<0.000000e+00> : vector<8x256xf32>
    %38 = tpu.matmul %37, %35, %cst_29 {dimension_numbers = #tpu.dot_dimension_numbers<[1], [0], [0], [1], [0, 0, 1, 1], [], []>} : vector<8x4xf32>, vector<4x256xf32>, vector<8x256xf32> -> vector<8x256xf32>
    %39 = arith.addf %30, %38 : vector<8x256xf32>
    %c1_i32 = arith.constant 1 : i32
    %40 = tpu.dynamic_rotate %11 by %c1_i32 dim 1 : vector<4x256xf32>, i32 -> vector<4x256xf32>
    %c3 = arith.constant 3 : index
    %c0_30 = arith.constant 0 : index
    %c0_31 = arith.constant 0 : index
    %41 = vector.load %arg7[%c3, %c0_30, %c0_31] : memref<9x1x256xf32, #tpu.memory_space<vmem>>, vector<1x1x256xf32>
    %42 = vector.shape_cast %41 : vector<1x1x256xf32> to vector<1x256xf32>
    %43 = vector.broadcast %42 : vector<1x256xf32> to vector<4x256xf32>
    %44 = arith.mulf %40, %43 : vector<4x256xf32>
    %c3_32 = arith.constant 3 : index
    %c0_33 = arith.constant 0 : index
    %c0_34 = arith.constant 0 : index
    %45 = vector.load %arg4[%c3_32, %c0_33, %c0_34] : memref<9x8x4xf32, #tpu.memory_space<vmem>>, vector<1x8x4xf32>
    %46 = vector.shape_cast %45 : vector<1x8x4xf32> to vector<8x4xf32>
    %cst_35 = arith.constant dense<0.000000e+00> : vector<8x256xf32>
    %47 = tpu.matmul %46, %44, %cst_35 {dimension_numbers = #tpu.dot_dimension_numbers<[1], [0], [0], [1], [0, 0, 1, 1], [], []>} : vector<8x4xf32>, vector<4x256xf32>, vector<8x256xf32> -> vector<8x256xf32>
    %48 = arith.addf %39, %47 : vector<8x256xf32>
    %c4 = arith.constant 4 : index
    %c0_36 = arith.constant 0 : index
    %c0_37 = arith.constant 0 : index
    %49 = vector.load %arg4[%c4, %c0_36, %c0_37] : memref<9x8x4xf32, #tpu.memory_space<vmem>>, vector<1x8x4xf32>
    %50 = vector.shape_cast %49 : vector<1x8x4xf32> to vector<8x4xf32>
    %cst_38 = arith.constant dense<0.000000e+00> : vector<8x256xf32>
    %51 = tpu.matmul %50, %11, %cst_38 {dimension_numbers = #tpu.dot_dimension_numbers<[1], [0], [0], [1], [0, 0, 1, 1], [], []>} : vector<8x4xf32>, vector<4x256xf32>, vector<8x256xf32> -> vector<8x256xf32>
    %52 = arith.addf %48, %51 : vector<8x256xf32>
    %c255_i32 = arith.constant 255 : i32
    %53 = tpu.dynamic_rotate %11 by %c255_i32 dim 1 : vector<4x256xf32>, i32 -> vector<4x256xf32>
    %c5 = arith.constant 5 : index
    %c0_39 = arith.constant 0 : index
    %c0_40 = arith.constant 0 : index
    %54 = vector.load %arg7[%c5, %c0_39, %c0_40] : memref<9x1x256xf32, #tpu.memory_space<vmem>>, vector<1x1x256xf32>
    %55 = vector.shape_cast %54 : vector<1x1x256xf32> to vector<1x256xf32>
    %56 = vector.broadcast %55 : vector<1x256xf32> to vector<4x256xf32>
    %57 = arith.mulf %53, %56 : vector<4x256xf32>
    %c5_41 = arith.constant 5 : index
    %c0_42 = arith.constant 0 : index
    %c0_43 = arith.constant 0 : index
    %58 = vector.load %arg4[%c5_41, %c0_42, %c0_43] : memref<9x8x4xf32, #tpu.memory_space<vmem>>, vector<1x8x4xf32>
    %59 = vector.shape_cast %58 : vector<1x8x4xf32> to vector<8x4xf32>
    %cst_44 = arith.constant dense<0.000000e+00> : vector<8x256xf32>
    %60 = tpu.matmul %59, %57, %cst_44 {dimension_numbers = #tpu.dot_dimension_numbers<[1], [0], [0], [1], [0, 0, 1, 1], [], []>} : vector<8x4xf32>, vector<4x256xf32>, vector<8x256xf32> -> vector<8x256xf32>
    %61 = arith.addf %52, %60 : vector<8x256xf32>
    %c241_i32 = arith.constant 241 : i32
    %62 = tpu.dynamic_rotate %11 by %c241_i32 dim 1 : vector<4x256xf32>, i32 -> vector<4x256xf32>
    %c6 = arith.constant 6 : index
    %c0_45 = arith.constant 0 : index
    %c0_46 = arith.constant 0 : index
    %63 = vector.load %arg7[%c6, %c0_45, %c0_46] : memref<9x1x256xf32, #tpu.memory_space<vmem>>, vector<1x1x256xf32>
    %64 = vector.shape_cast %63 : vector<1x1x256xf32> to vector<1x256xf32>
    %65 = vector.broadcast %64 : vector<1x256xf32> to vector<4x256xf32>
    %66 = arith.mulf %62, %65 : vector<4x256xf32>
    %c6_47 = arith.constant 6 : index
    %c0_48 = arith.constant 0 : index
    %c0_49 = arith.constant 0 : index
    %67 = vector.load %arg4[%c6_47, %c0_48, %c0_49] : memref<9x8x4xf32, #tpu.memory_space<vmem>>, vector<1x8x4xf32>
    %68 = vector.shape_cast %67 : vector<1x8x4xf32> to vector<8x4xf32>
    %cst_50 = arith.constant dense<0.000000e+00> : vector<8x256xf32>
    %69 = tpu.matmul %68, %66, %cst_50 {dimension_numbers = #tpu.dot_dimension_numbers<[1], [0], [0], [1], [0, 0, 1, 1], [], []>} : vector<8x4xf32>, vector<4x256xf32>, vector<8x256xf32> -> vector<8x256xf32>
    %70 = arith.addf %61, %69 : vector<8x256xf32>
    %c240_i32 = arith.constant 240 : i32
    %71 = tpu.dynamic_rotate %11 by %c240_i32 dim 1 : vector<4x256xf32>, i32 -> vector<4x256xf32>
    %c7 = arith.constant 7 : index
    %c0_51 = arith.constant 0 : index
    %c0_52 = arith.constant 0 : index
    %72 = vector.load %arg7[%c7, %c0_51, %c0_52] : memref<9x1x256xf32, #tpu.memory_space<vmem>>, vector<1x1x256xf32>
    %73 = vector.shape_cast %72 : vector<1x1x256xf32> to vector<1x256xf32>
    %74 = vector.broadcast %73 : vector<1x256xf32> to vector<4x256xf32>
    %75 = arith.mulf %71, %74 : vector<4x256xf32>
    %c7_53 = arith.constant 7 : index
    %c0_54 = arith.constant 0 : index
    %c0_55 = arith.constant 0 : index
    %76 = vector.load %arg4[%c7_53, %c0_54, %c0_55] : memref<9x8x4xf32, #tpu.memory_space<vmem>>, vector<1x8x4xf32>
    %77 = vector.shape_cast %76 : vector<1x8x4xf32> to vector<8x4xf32>
    %cst_56 = arith.constant dense<0.000000e+00> : vector<8x256xf32>
    %78 = tpu.matmul %77, %75, %cst_56 {dimension_numbers = #tpu.dot_dimension_numbers<[1], [0], [0], [1], [0, 0, 1, 1], [], []>} : vector<8x4xf32>, vector<4x256xf32>, vector<8x256xf32> -> vector<8x256xf32>
    %79 = arith.addf %70, %78 : vector<8x256xf32>
    %c239_i32 = arith.constant 239 : i32
    %80 = tpu.dynamic_rotate %11 by %c239_i32 dim 1 : vector<4x256xf32>, i32 -> vector<4x256xf32>
    %c8 = arith.constant 8 : index
    %c0_57 = arith.constant 0 : index
    %c0_58 = arith.constant 0 : index
    %81 = vector.load %arg7[%c8, %c0_57, %c0_58] : memref<9x1x256xf32, #tpu.memory_space<vmem>>, vector<1x1x256xf32>
    %82 = vector.shape_cast %81 : vector<1x1x256xf32> to vector<1x256xf32>
    %83 = vector.broadcast %82 : vector<1x256xf32> to vector<4x256xf32>
    %84 = arith.mulf %80, %83 : vector<4x256xf32>
    %c8_59 = arith.constant 8 : index
    %c0_60 = arith.constant 0 : index
    %c0_61 = arith.constant 0 : index
    %85 = vector.load %arg4[%c8_59, %c0_60, %c0_61] : memref<9x8x4xf32, #tpu.memory_space<vmem>>, vector<1x8x4xf32>
    %86 = vector.shape_cast %85 : vector<1x8x4xf32> to vector<8x4xf32>
    %cst_62 = arith.constant dense<0.000000e+00> : vector<8x256xf32>
    %87 = tpu.matmul %86, %84, %cst_62 {dimension_numbers = #tpu.dot_dimension_numbers<[1], [0], [0], [1], [0, 0, 1, 1], [], []>} : vector<8x4xf32>, vector<4x256xf32>, vector<8x256xf32> -> vector<8x256xf32>
    %88 = arith.addf %79, %87 : vector<8x256xf32>
    %c0_63 = arith.constant 0 : index
    %c0_64 = arith.constant 0 : index
    %89 = vector.load %arg5[%c0_63, %c0_64] : memref<8x4xf32, #tpu.memory_space<vmem>>, vector<8x4xf32>
    %90 = arith.mulf %7, %7 : vector<4x1xf32>
    %cst_65 = arith.constant dense<0.000000e+00> : vector<8x1xf32>
    %91 = tpu.matmul %89, %90, %cst_65 {dimension_numbers = #tpu.dot_dimension_numbers<[1], [0], [0], [1], [0, 0, 1, 1], [], []>} : vector<8x4xf32>, vector<4x1xf32>, vector<8x1xf32> -> vector<8x1xf32>
    %cst_66 = arith.constant 0.027777778 : f32
    %92 = vector.broadcast %cst_66 : f32 to vector<8x1xf32>
    %93 = arith.mulf %92, %91 : vector<8x1xf32>
    %cst_67 = arith.constant 9.99999993E-9 : f32
    %94 = vector.broadcast %cst_67 : f32 to vector<8x1xf32>
    %95 = arith.addf %93, %94 : vector<8x1xf32>
    %96 = math.rsqrt %95 : vector<8x1xf32>
    %cst_68 = arith.constant 0.166666672 : f32
    %97 = vector.broadcast %cst_68 : f32 to vector<8x1xf32>
    %98 = arith.mulf %97, %96 : vector<8x1xf32>
    %99 = vector.broadcast %98 : vector<8x1xf32> to vector<8x256xf32>
    %100 = arith.mulf %88, %99 : vector<8x256xf32>
    %c0_69 = arith.constant 0 : index
    %c0_70 = arith.constant 0 : index
    %c0_71 = arith.constant 0 : index
    %101 = vector.load %arg8[%c0_69, %c0_70, %c0_71] : memref<1x8x256xf32, #tpu.memory_space<vmem>>, vector<1x8x256xf32>
    %102 = vector.shape_cast %101 : vector<1x8x256xf32> to vector<8x256xf32>
    %103 = vector.shape_cast %100 : vector<8x256xf32> to vector<1x8x256xf32>
    tpu.vector_store %arg8[%c0_69, %c0_70, %c0_71], %103 {strides = array<i32>} : memref<1x8x256xf32, #tpu.memory_space<vmem>>, vector<1x8x256xf32>,
    return
  }
  func.func @transform_0(%arg0: i32) -> (i32, i32, i32) {
    %c0_i32 = arith.constant 0 : i32
    %c0_i32_0 = arith.constant 0 : i32
    %c0_i32_1 = arith.constant 0 : i32
    return %arg0, %c0_i32, %c0_i32_0 : i32, i32, i32
  }
  func.func @transform_1(%arg0: i32) -> (i32, i32) {
    %c0_i32 = arith.constant 0 : i32
    %c0_i32_0 = arith.constant 0 : i32
    %c0_i32_1 = arith.constant 0 : i32
    return %c0_i32, %c0_i32_0 : i32, i32
  }
  func.func @transform_2(%arg0: i32) -> (i32, i32) {
    %c0_i32 = arith.constant 0 : i32
    %c0_i32_0 = arith.constant 0 : i32
    %c0_i32_1 = arith.constant 0 : i32
    return %c0_i32, %c0_i32_0 : i32, i32
  }
  func.func @transform_3(%arg0: i32) -> (i32, i32, i32) {
    %c0_i32 = arith.constant 0 : i32
    %c0_i32_0 = arith.constant 0 : i32
    %c0_i32_1 = arith.constant 0 : i32
    %c0_i32_2 = arith.constant 0 : i32
    return %c0_i32, %c0_i32_0, %c0_i32_1 : i32, i32, i32
  }
  func.func @transform_4(%arg0: i32) -> (i32, i32) {
    %c0_i32 = arith.constant 0 : i32
    %c0_i32_0 = arith.constant 0 : i32
    %c0_i32_1 = arith.constant 0 : i32
    return %c0_i32, %c0_i32_0 : i32, i32
  }
  func.func @transform_5(%arg0: i32) -> (i32, i32, i32) {
    %c0_i32 = arith.constant 0 : i32
    %c0_i32_0 = arith.constant 0 : i32
    %c0_i32_1 = arith.constant 0 : i32
    return %arg0, %c0_i32, %c0_i32_0 : i32, i32, i32
  }
  func.func @transform_6(%arg0: i32) -> (i32, i32, i32) {
    %c0_i32 = arith.constant 0 : i32
    %c0_i32_0 = arith.constant 0 : i32
    %c0_i32_1 = arith.constant 0 : i32
    %c0_i32_2 = arith.constant 0 : i32
    return %c0_i32, %c0_i32_0, %c0_i32_1 : i32, i32, i32
  }
  func.func @transform_7(%arg0: i32) -> (i32, i32, i32) {
    %c0_i32 = arith.constant 0 : i32
    %c0_i32_0 = arith.constant 0 : i32
    %c0_i32_1 = arith.constant 0 : i32
    return %arg0, %c0_i32, %c0_i32_0 : i32, i32, i32
  }
}

</mosaic_0001>

<bundles_post_ra>
// kernel: tpu_custom_call.1
= control target key start
LH: loop header
LB: loop body
LE: loop exit
PB: predicated region body
PF: predicated region fallthrough
CT: control target
= control target key end

     0   :  { %12 = vsyncpa [#allocation3], 0  ;;  %s1917_s0 = inlined_call_operand.vmem [shape: f32[2,1,32], index: 0, kind: input, shape index: {}]   ;;  %s1918_s1 = inlined_call_operand.vmem [shape: f32[4,32], index: 1, kind: input, shape index: {}]   ;;  %s1919_s2 = inlined_call_operand.vmem [shape: f32[4,1], index: 2, kind: input, shape index: {}]   ;;  %s1920_s3 = inlined_call_operand.vmem [shape: f32[9,8,4], index: 3, kind: input, shape index: {}]   ;;  %s1921_s4 = inlined_call_operand.vmem [shape: f32[8,4], index: 4, kind: input, shape index: {}]   ;;  %s1922_s5 = inlined_call_operand.vmem [shape: f32[2,4,256], index: 5, kind: input, shape index: {}]   ;;  %s1923_s6 = inlined_call_operand.vmem [shape: f32[9,1,256], index: 6, kind: input, shape index: {}]   ;;  %s1924_s7 = inlined_call_operand.hbm [shape: f32[2,8,256], index: 7, kind: output, shape index: {}]  }
   0x1   :  { %14 = vsyncpa [#allocation3 + $0x1], 0  ;;  %s1679_s24 = smov 0   ;;  %s1681_s25 = smov 0  }
   0x2   :  { %s1683_s26 = smov 0   ;;  %s1685_s27 = smov 0  }
   0x3 LB: > { %s1700_s28 = sadd.s32 4294967295, %s1624_s27   ;;  %s1426_s29 = sadd.s32 4294967294, %s1624_s27   ;;  %s1624_s27 = sphi %s1685_s27, %s1930_s27   ;;  %s1620_s26 = sphi %s1683_s26, %s1929_s26   ;;  %s1616_s25 = sphi %s1681_s25, %s1928_s25   ;;  %s1612_s24 = sphi %s1679_s24, %s1927_s24  }
   0x4   : > { %s1704_s30 = sadd.s32 1, %s1624_s27   ;;  %s184_s8 = sadd.s32 1, %s1620_s26 }
   0x5   : > { %s181_s9 = ssub.s32 %s1624_s27, %s1704_s30  ;;  %p194_p0 = scmp.ne.s32.totalorder %s1620_s26, %s1616_s25 }
   0x6   : > { %p182_p1 = scmp.eq.s32.totalorder %s181_s9, 0  ;;  %p195_p2 = scmp.eq.s32.totalorder %s1700_s28, 1 }
   0x7   : > { %p200_p3 = scmp.ne.s32.totalorder %s1616_s25, %s1612_s24  ;;  %p201_p4 = scmp.eq.s32.totalorder %s1426_s29, 1 }
   0x8   : > { %s1715_s10 = scalar_select %p182_p1, %s1620_s26, %s184_s8  }
   0x9   : > { %p1717_p5 = por %p195_p2, %p194_p0  ;;  %p1721_p6 = por %p201_p4, %p200_p3 }
   0xa   : > { %p1429_p7 = scmp.ge.s32.totalorder %s1624_s27, 1  ;;  %p248_p8 = scmp.lt.s32.totalorder %s1624_s27, 3 }
   0xc   : > { %p249_p9 = pnand %p1429_p7, %p248_p8 }
   0xd   : > { %p283_p10 = scmp.lt.s32.totalorder (!%p249_p9), %s1700_s28, 1  ;;  %v291_v0 = vld [vmem:[%s1918_s1] sm:$0xf] (!%p249_p9)  ;;  %vm300_vm0 = vcmask (!%p249_p9), 257024   ;;  %v1626_v4 = vmov (!%p249_p9), 0   ;;  %v315_v11 = vlaneseq (!%p249_p9)  ;;  %v1628_v17 = vmov (!%p249_p9), 0.0  }
   0xe   : > { %252 = sbr.rel (%p249_p9) target bundleno = 831 (0x33f), region = 48  ;;  %1559 = vset.pattern.permute.xlu0 (!%p249_p9), %v1626_v4  ;;  %v305_v5 = vld [vmem:[%s1919_s2] sm:$0xf] (!%p249_p9)  ;;  %v1627_v9 = vmov (!%p249_p9), 839922192   ;;  %447 = vmatprep.mubr.f32.mxu1 (!%p249_p9), %v1628_v17  ;;  %vm376_vm1 = vcmask (!%p249_p9), 1043456  }
   0xf   : > { %v313_v10 = vunpack.c.l.s4 (!%p249_p9), %v1627_v9  ;;  %v316_v13 = vshrl.u32 (!%p249_p9), %v315_v11, 7  ;;  %819 = vmatprep.mubr.f32.mxu0 (!%p249_p9), %v1628_v17  ;;  %s1629_s8 = smov (!%p249_p9), 112   ;;  %s1630_s9 = smov (!%p249_p9), 16   ;;  %vm372_vm2 = vcmask (!%p249_p9), 31744   ;;  %v1452_v21 = vld [vmem:[%s1920_s3 + $0x20] sm:$0xff] (!%p249_p9)  ;;  %v1753_v22 = vand.u32 (!%p249_p9), 127, %v315_v11 }
  0x10   : > { %s1632_s14 = smov (!%p249_p9), 17   ;;  %s1633_s15 = smov (!%p249_p9), 15   ;;  %v1434_v25 = vld [vmem:[%s1923_s6 + $0x2] sm:$0x3] (!%p249_p9)  ;;  %v1435_v34 = vld [vmem:[%s1920_s3 + $0x8] sm:$0xff] (!%p249_p9)  ;;  %v1443_v54 = vld [vmem:[%s1920_s3 + $0x10] sm:$0xff] (!%p249_p9) }
  0x11   : > { %v314_v12 = vunpack.c.0.s8 (!%p249_p9), %v313_v10  ;;  %s1635_s19 = smov (!%p249_p9), 127   ;;  %s1636_s20 = smov (!%p249_p9), 113   ;;  %v1755_v23 = vsub.s32 (!%p249_p9), 0, %v316_v13  ;;  %v1757_v24 = vsub.s32 (!%p249_p9), 1, %v316_v13  ;;  %vm352_vm3 = vcmp.lt.s32.totalorder (!%p249_p9), %v1753_v22, 16  ;;  %v347_v44 = vld [vmem:[%s1920_s3] sm:$0xff] (!%p249_p9) }
  0x12   : > { %v333_v35 = vld [vmem:[%s1923_s6] sm:$0x3] (!%p249_p9)  ;;  %vm330_vm4 = vcmp.lt.s32.totalorder (!%p249_p9), %v1753_v22, 17  ;;  %v1442_v45 = vld [vmem:[%s1923_s6 + $0x4] sm:$0x3] (!%p249_p9)  ;;  %vm538_vm5 = vcmp.lt.s32.totalorder (!%p249_p9), %v1753_v22, 15 }
  0x13   : > { %v317_v14 = vsub.s32 (!%p249_p9), %v314_v12, %v316_v13  ;;  %v361_v27 = vrot.slane (!%p249_p9), %v1434_v25, %v1755_v23  ;;  %v365_v28 = vrot.slane (!%p249_p9), %v1434_v25, %v1757_v24  ;;  %v338_v37 = vrot.slane (!%p249_p9), %v333_v35, %v1755_v23  ;;  %v1447_v55 = vld [vmem:[%s1923_s6 + $0x6] sm:$0x3] (!%p249_p9)  ;;  %v1457_v12 = vld [vmem:[%s1920_s3 + $0x28] sm:$0xff] (!%p249_p9) }
  0x14   : > { %v342_v38 = vrot.slane (!%p249_p9), %v333_v35, %v1757_v24  ;;  %v547_v47 = vrot.slane (!%p249_p9), %v1442_v45, %v1755_v23  ;;  %v551_v48 = vrot.slane (!%p249_p9), %v1442_v45, %v1757_v24  ;;  %vm644_vm6 = vcmp.lt.s32.totalorder (!%p249_p9), %v1753_v22, 1  ;;  %v1461_v13 = vld [vmem:[%s1923_s6 + $0xc] sm:$0x3] (!%p249_p9) }
  0x15   : > { %s284_s13 = scalar_select %p283_p10, %s1700_s28, 1  ;;  %v653_v57 = vrot.slane %v1447_v55, %v1755_v23  ;;  %v657_v58 = vrot.slane %v1447_v55, %v1757_v24  ;;  %vm832_vm7 = vcmp.lt.s32.totalorder %v1753_v22, 127  ;;  %vm1637_vm8 = vmmov 0  }
  0x16   : > { %vm938_vm9 = vcmp.lt.s32.totalorder %v1753_v22, 113  ;;  %vm1044_vm10 = vcmp.lt.s32.totalorder %v1753_v22, 112  ;;  %vm1150_vm11 = vcmp.lt.s32.totalorder %v1753_v22, 111 }
  0x17   : > { %s285_s18 = scalar_lea.vmem %s1917_s0, %s284_s13  ;;  %s1483_s21 = sshll.u32 %s284_s13, 3 }
  0x18   : > { %v1433_v1 = vld [vmem:[%s285_s18] ss:$0 sm:$0xff]  ;;  %s290_s29 = scalar_lea.vmem %s1922_s5, %s1483_s21  ;;  %s1631_s13 = smov 111  }
  0x19   : > { %v299_v2 = vmul.f32 %v1433_v1, %v291_v0  ;;  %v307_v15 = vld [vmem:[%s290_s29] sm:$0xff]  ;;  %s1634_s18 = smov 1   ;;  %v1448_v0 = vld [vmem:[%s1920_s3 + $0x18] sm:$0xff]  ;;  %v1456_v1 = vld [vmem:[%s1923_s6 + $0xa] sm:$0x3] }
  0x1a   : > { %v841_v4 = vrot.slane %v1456_v1, %v1755_v23 }
  0x1b   : > { %v301_v3 = vsel %vm300_vm0, %v299_v2, 0.0 }
  0x1c   : > { %302 = vadd.xlane.f32.xlu0 %v301_v3 }
  0xa9   : > { %v303_v6 = vpop.xlane.xlu0 %302 }
  0xaa   : > { %v304_v7 = vmul.f32 0.17677669, %v303_v6  ;;  %v1252_v6 = vld [vmem:[%s1921_s4] sm:$0xff] }
  0xac   : > { %v1738_v8 = vadd.f32 %v305_v5, %v304_v7  ;;  %v845_v5 = vrot.slane %v1456_v1, %v1757_v24 }
  0xae   : > { %310 = vperm.xlu0 %1559, %v1738_v8   ;;  %v1253_v3 = vmul.f32 %v1738_v8, %v1738_v8 }
 0x12d   : > { %v311_v16 = vpop.permute.xlu0 %310 }
 0x12e   : > { %v318_v18 = vrot.slane %v311_v16, %v317_v14  ;;  %v951_v16 = vrot.slane %v1461_v13, %v1757_v24 }
 0x130   : > { %v320_v19 = vmul.f32 %v318_v18, %v307_v15  ;;  %v947_v15 = vrot.slane %v1461_v13, %v1755_v23  ;;  %v1466_v18 = vld [vmem:[%s1923_s6 + $0xe] sm:$0x3] }
 0x132   : > { %1040 = vrot.lane.b32.xlu0 %v320_v19, %s1629_s8  ;;  %348 = vrot.lane.b32.xlu1 %v320_v19, %s1630_s9  ;;  %v322_v20 = vcombine.high %v320_v19, %v320_v19 }
 0x134   : > { %1453 = vmatprep.subr.msk.mxu0 %vm376_vm1, %v322_v20 }
 0x135   : > { %1454 = vmatpush1.msk.msra.mxu0 %vm376_vm1, %v320_v19 }
 0x136   : > { %1146 = vrot.lane.b32.xlu0 %v320_v19, %s1631_s13  ;;  %350 = vrot.lane.b32.xlu1 %v322_v20, %s1630_s9 }
 0x137   : > { %1455 = vmatmul.mubr.msk.f32.vlgmr.msra.gmra.mrb[0].mxu0 %vm372_vm2, %v1452_v21 }
 0x138   : > { %925 = vmatprep.mubr.f32.mxu0 %v1628_v17 }
 0x13a   : > { %324 = vrot.lane.b32.xlu1 %v320_v19, %s1632_s14 }
 0x13e   : > { %326 = vrot.lane.b32.xlu1 %v322_v20, %s1632_s14 }
 0x142   : > { %534 = vrot.lane.b32.xlu1 %v320_v19, %s1633_s15 }
 0x146   : > { %536 = vrot.lane.b32.xlu1 %v322_v20, %s1633_s15  ;;  %s1484_s15 = sshll.u32 %s1700_s28, 8  ;;  %s1638_s28 = smov [#allocation2]  }
 0x147   : > { %s1566_s23 = sshll.u32 %s1638_s28, 4  ;;  %s1567_s23 = int_to_ptr.vmem [resolvable:$false] %s1566_s23 }
 0x148   : > { %s1568_s29 = scalar_lea.vmem %s1567_s23, 512 }
 0x14a   : > { %640 = vrot.lane.b32.xlu1 %v320_v19, %s1634_s18 }
 0x14e   : > { %642 = vrot.lane.b32.xlu1 %v322_v20, %s1634_s18 }
 0x152   : > { %828 = vrot.lane.b32.xlu1 %v320_v19, %s1635_s19 }
 0x156   : > { %830 = vrot.lane.b32.xlu1 %v322_v20, %s1635_s19 }
 0x15a   : > { %934 = vrot.lane.b32.xlu1 %v320_v19, %s1636_s20 }
 0x15e   : > { %936 = vrot.lane.b32.xlu1 %v322_v20, %s1636_s20  ;;  %s1875_s20 = scalar_lea.hbm %s1924_s7, %s1484_s15 }
 0x162   : > { %1042 = vrot.lane.b32.xlu1 %v322_v20, %s1629_s8 }
 0x166   : > { %1148 = vrot.lane.b32.xlu1 %v322_v20, %s1631_s13  ;;  %s280_s13 = sand.u32 1, %s1616_s25  }
 0x167   : > { %s1430_s14 = sshll.u32 %s280_s13, 4  ;;  %s1344_s21 = scalar_lea.sflag [#allocation3], %s280_s13 }
 0x168   : > { %s282_s16 = scalar_lea.vmem [#allocation2], %s1430_s14 }
 0x169   : > { %s1358_s17 = sshll.u32 %s282_s16, 4  ;;  %s1877_s17 = int_to_ptr.vmem [resolvable:$true] %s1358_s17 }
 0x16a   : > { %s1562_s22 = scalar_lea.vmem %s1877_s17, 256  ;;  %p1569_p0 = scmp.lt.s32.totalorder %s1877_s17, %s1567_s23 }
 0x16b   : > { %p1563_p11 = scmp.ne.s32.totalorder %s1877_s17, %s1562_s22  ;;  %p1570_p1 = scmp.lt.s32.totalorder %s1568_s29, %s1562_s22 }
 0x16d   : > { %p1564_p12 = pnand %p1563_p11, %p1717_p5  ;;  %p1571_p2 = por %p1570_p1, %p1569_p0 }
 0x16f   : > { %p1565_p13 = pneg %p1564_p12 }
 0x171   : > { %p1572_p3 = pnand %p1571_p2, %p1565_p13 }
 0x1a4   : > { %v349_v26 = vpop.permute.xlu1 %348  ;;  %v1041_v25 = vpop.permute.xlu0 %1040 }
 0x1a8   : > { %v351_v29 = vpop.permute.xlu1 %350 }
 0x1a9   : > { %v353_v30 = vsel %vm352_vm3, %v349_v26, %v351_v29  ;;  %v354_v31 = vsel %vm352_vm3, %v351_v29, %v349_v26  ;;  %v1057_v29 = vrot.slane %v1466_v18, %v1757_v24 }
 0x1aa   : > { %v368_v32 = vmul.f32 %v361_v27, %v354_v31  ;;  %v369_v33 = vmul.f32 %v365_v28, %v353_v30  ;;  %v1053_v28 = vrot.slane %v1466_v18, %v1755_v23  ;;  %v1462_v30 = vld [vmem:[%s1920_s3 + $0x30] sm:$0xff] }
 0x1ab   : > { %v1471_v31 = vld [vmem:[%s1923_s6 + $0x10] sm:$0x3] }
 0x1ac   : > { %1436 = vmatprep.subr.msk.mxu1 %vm376_vm1, %v369_v33  ;;  %v325_v36 = vpop.permute.xlu1 %324 }
 0x1ad   : > { %1437 = vmatpush1.msk.msra.mxu1 %vm376_vm1, %v368_v32 }
 0x1ae   : > { %1438 = vmatmul.mubr.msk.f32.vlgmr.msra.gmra.mrb[0].mxu1 %vm372_vm2, %v1435_v34 }
 0x1af   : > { %527 = vmatprep.mubr.f32.mxu1 %v1628_v17 }
 0x1b0   : > { %v327_v39 = vpop.permute.xlu1 %326 }
 0x1b1   : > { %v331_v40 = vsel %vm330_vm4, %v325_v36, %v327_v39  ;;  %v332_v41 = vsel %vm330_vm4, %v327_v39, %v325_v36  ;;  %v1147_v39 = vpop.permute.xlu0 %1146 }
 0x1b2   : > { %v345_v42 = vmul.f32 %v338_v37, %v332_v41  ;;  %v346_v43 = vmul.f32 %v342_v38, %v331_v40  ;;  %v1159_v37 = vrot.slane %v1471_v31, %v1755_v23  ;;  %v1163_v38 = vrot.slane %v1471_v31, %v1757_v24  ;;  %v1472_v23 = vld [vmem:[%s1920_s3 + $0x40] sm:$0xff] }
 0x1b4   : > { %1439 = vmatprep.subr.msk.mxu1 %vm376_vm1, %v346_v43  ;;  %v535_v46 = vpop.permute.xlu1 %534 }
 0x1b5   : > { %1440 = vmatpush1.msk.msra.mxu1 %vm376_vm1, %v345_v42 }
 0x1b6   : > { %1441 = vmatmul.mubr.msk.f32.vlgmr.msra.gmra.mrb[0].mxu1 %vm372_vm2, %v347_v44  ;;  %v1467_v44 = vld [vmem:[%s1920_s3 + $0x38] sm:$0xff] }
 0x1b7   : > { %631 = vmatprep.mubr.f32.mxu1 %v1628_v17 }
 0x1b8   : > { %v537_v49 = vpop.permute.xlu1 %536 }
 0x1b9   : > { %v539_v50 = vsel %vm538_vm5, %v535_v46, %v537_v49  ;;  %v540_v51 = vsel %vm538_vm5, %v537_v49, %v535_v46 }
 0x1ba   : > { %v554_v52 = vmul.f32 %v547_v47, %v540_v51  ;;  %v555_v53 = vmul.f32 %v551_v48, %v539_v50 }
 0x1bc   : > { %1444 = vmatprep.subr.msk.mxu1 %vm376_vm1, %v555_v53  ;;  %v641_v56 = vpop.permute.xlu1 %640 }
 0x1bd   : > { %1445 = vmatpush1.msk.msra.mxu1 %vm376_vm1, %v554_v52 }
 0x1be   : > { %1446 = vmatmul.mubr.msk.f32.vlgmr.msra.gmra.mrb[0].mxu1 %vm372_vm2, %v1443_v54 }
 0x1bf   : > { %737 = vmatprep.mubr.f32.mxu1 %v1628_v17 }
 0x1c0   : > { %v643_v59 = vpop.permute.xlu1 %642 }
 0x1c1   : > { %v645_v60 = vsel %vm644_vm6, %v641_v56, %v643_v59  ;;  %v646_v61 = vsel %vm644_vm6, %v643_v59, %v641_v56 }
 0x1c2   : > { %v660_v62 = vmul.f32 %v653_v57, %v646_v61  ;;  %v661_v63 = vmul.f32 %v657_v58, %v645_v60 }
 0x1c4   : > { %1449 = vmatprep.subr.msk.mxu1 %vm376_vm1, %v661_v63  ;;  %v829_v2 = vpop.permute.xlu1 %828 }
 0x1c5   : > { %1450 = vmatpush1.msk.msra.mxu1 %vm376_vm1, %v660_v62 }
 0x1c6   : > { %1451 = vmatmul.mubr.msk.f32.vlgmr.msra.gmra.mrb[0].mxu1 %vm372_vm2, %v1448_v0  ;;  %1487 = vmatprep.subr.mxu1 %v1628_v17 }
 0x1c7   : > { %1488 = vmatpush3.msk.msra.mxu1 %vm376_vm1, %v1253_v3  ;;  %1489 = vmatprep.mubr.msk.f32.mxu1 %vm1637_vm8, %v1628_v17 }
 0x1c8   : > { %v831_v7 = vpop.permute.xlu1 %830 }
 0x1c9   : > { %v833_v8 = vsel %vm832_vm7, %v829_v2, %v831_v7  ;;  %v834_v9 = vsel %vm832_vm7, %v831_v7, %v829_v2 }
 0x1ca   : > { %v848_v10 = vmul.f32 %v841_v4, %v833_v8  ;;  %v849_v11 = vmul.f32 %v845_v5, %v834_v9  ;;  %1490 = vmatmul.mubr.msk.f32.vlgmr.msra.gmra.mrb[2].mxu1 %vm372_vm2, %v1252_v6 }
 0x1cc   : > { %v935_v14 = vpop.permute.xlu1 %934  ;;  %1458 = vmatprep.subr.msk.mxu0 %vm376_vm1, %v849_v11 }
 0x1cd   : > { %1459 = vmatpush1.msk.msra.mxu0 %vm376_vm1, %v848_v10 }
 0x1ce   : > { %1460 = vmatmul.mubr.msk.f32.vlgmr.msra.gmra.mrb[0].mxu0 %vm372_vm2, %v1457_v12 }
 0x1cf   : > { %1031 = vmatprep.mubr.f32.mxu0 %v1628_v17 }
 0x1d0   : > { %v937_v19 = vpop.permute.xlu1 %936 }
 0x1d1   : > { %v939_v20 = vsel %vm938_vm9, %v935_v14, %v937_v19  ;;  %v940_v21 = vsel %vm938_vm9, %v937_v19, %v935_v14 }
 0x1d2   : > { %v954_v26 = vmul.f32 %v947_v15, %v939_v20  ;;  %v955_v27 = vmul.f32 %v951_v16, %v940_v21 }
 0x1d4   : > { %v1043_v32 = vpop.permute.xlu1 %1042  ;;  %1463 = vmatprep.subr.msk.mxu0 %vm376_vm1, %v955_v27 }
 0x1d5   : > { %v1045_v33 = vsel %vm1044_vm10, %v1041_v25, %v1043_v32  ;;  %v1046_v34 = vsel %vm1044_vm10, %v1043_v32, %v1041_v25  ;;  %1464 = vmatpush1.msk.msra.mxu0 %vm376_vm1, %v954_v26 }
 0x1d6   : > { %v1060_v35 = vmul.f32 %v1053_v28, %v1045_v33  ;;  %v1061_v36 = vmul.f32 %v1057_v29, %v1046_v34  ;;  %1465 = vmatmul.mubr.msk.f32.vlgmr.msra.gmra.mrb[0].mxu0 %vm372_vm2, %v1462_v30 }
 0x1d7   : > { %1137 = vmatprep.mubr.f32.mxu0 %v1628_v17 }
 0x1d8   : > { %v1149_v40 = vpop.permute.xlu1 %1148  ;;  %1468 = vmatprep.subr.msk.mxu0 %vm376_vm1, %v1061_v36 }
 0x1d9   : > { %v1151_v41 = vsel %vm1150_vm11, %v1147_v39, %v1149_v40  ;;  %v1152_v42 = vsel %vm1150_vm11, %v1149_v40, %v1147_v39  ;;  %1469 = vmatpush1.msk.msra.mxu0 %vm376_vm1, %v1060_v35 }
 0x1da   : > { %v1166_v43 = vmul.f32 %v1159_v37, %v1151_v41  ;;  %v1167_v22 = vmul.f32 %v1163_v38, %v1152_v42 }
 0x1dc   : > { %1473 = vmatprep.subr.msk.mxu0 %vm376_vm1, %v1167_v22 }
 0x1de   : > { %1470 = vmatmul.mubr.msk.f32.vlgmr.msra.gmra.mrb[0].mxu0 %vm372_vm2, %v1467_v44 }
 0x1df   : > { %1474 = vmatpush1.msk.msra.mxu0 %vm376_vm1, %v1166_v43  ;;  %1243 = vmatprep.mubr.f32.mxu0 %v1628_v17 }
 0x1e6   : > { %1475 = vmatmul.mubr.msk.f32.vlgmr.msra.gmra.mrb[0].mxu0 %vm372_vm2, %v1472_v23 }
 0x299   : > { %v739_v24 = vpop.f32.mrb[0].mxu1 }
 0x29a   : > { %v741_v45 = vpop.f32.mrb[1].mxu1 }
 0x29d   : > { %v1326_v46 = vpop.f32.mrb[2].mxu1 }
 0x29e   : > { %v1330_v47 = vmul.f32 0.027777778, %v1326_v46  ;;  %v1491_v48 = vpop.f32.mrb[3].mxu1 }
 0x2a0   : > { %v1331_v49 = vadd.f32 1e-08, %v1330_v47 }
 0x2a2   : > { %1560 = vrsqrt.f32 %v1331_v49 }
 0x2ac   : > { %v1561_v50 = vpop.eup %1560 }
 0x2ad   : > { %v1333_v51 = vmul.f32 0.16666667, %v1561_v50 }
 0x2af   : > { %1336 = vperm.xlu0 %1559, %v1333_v51  }
 0x2b9   : > { %v1245_v52 = vpop.f32.mrb[0].mxu0 }
 0x2ba   : > { %v1492_v17 = vadd.f32 %v1245_v52, %v739_v24  ;;  %v1247_v53 = vpop.f32.mrb[1].mxu0 }
 0x2bb   : > { %v1493_v54 = vadd.f32 %v1247_v53, %v741_v45 }
 0x32e   : > { %v1337_v55 = vpop.permute.xlu0 %1336 }
 0x32f   : > { %v1339_v56 = vmul.f32 %v1492_v17, %v1337_v55  ;;  %v1340_v57 = vmul.f32 %v1493_v54, %v1337_v55 }
 0x331   : > { %1341 = vst [vmem:[%s282_s16] sm:$0xff] %v1339_v56  ;;  %1342 = vst [vmem:[%s282_s16 + $0x8] sm:$0xff] %v1340_v57 }
 0x332   : > { %1575 = shalt.err (!%p1572_p3)
}
 0x333   : > { %s1576_s8 = scalar_lea.hbm %s1875_s20, 256  ;;  %s1580_s14 = scalar_lea.hbm %s1924_s7, 512 }
 0x334   : > { %p1577_p4 = scmp.ne.s32.totalorder %s1875_s20, %s1576_s8  ;;  %p1581_p9 = scmp.lt.u32.totalorder %s1875_s20, %s1924_s7 }
 0x335   : > { %p1582_p10 = scmp.lt.u32.totalorder %s1580_s14, %s1576_s8  ;;  %p1584_p12 = scmp.lt.u32.totalorder %s1576_s8, %s1875_s20 }
 0x336   : > { %p1578_p7 = pnand %p1577_p4, %p1717_p5 }
 0x337   : > { %p1583_p11 = por %p1582_p10, %p1581_p9 }
 0x338   : > { %p1579_p8 = pneg %p1578_p7 }
 0x339   : > { %p1585_p13 = por %p1584_p12, %p1583_p11 }
 0x33b   : > { %p1586_p0 = pnand %p1585_p13, %p1579_p8 }
 0x33d   : > { %1589 = shalt.err (!%p1586_p0)
}
 0x33e   : > { %1508 = dma.vmem_to_hbm [thread:$0]  (%p1717_p5), %s1877_s17, 256, %s1875_s20, %s1344_s21  }
 0x33f PF: > { %p1514_p1 = scmp.ge.s32.totalorder %s1624_s27, 2  ;;  %s1370_s18 = sand.u32 1, %s1612_s24  }
 0x340   : > { %s1371_s19 = scalar_lea.sflag [#allocation3], %s1370_s18 }
 0x341   : > { %p1511_p2 = pnand %p1514_p1, %p1721_p6 }
 0x343   : > { %1607 = dma.done.wait (!%p1511_p2), %s1371_s19, 256  }
 0x344   : > { %1609 = vsyncadd (!%p1511_p2), %s1371_s19, 4294967040  ;;  %p17_p3 = scmp.ge.s32.totalorder %s1704_s30, 4   ;;  %s1927_s24 = smov %s1616_s25 }
 0x345   : > { %s1928_s25 = smov %s1620_s26  ;;  %s1929_s26 = smov %s1715_s10 }
 0x346   : > { %s1930_s27 = smov %s1704_s30  ;;  %19 = sbr.rel (!%p17_p3) target bundleno = 3 (0x3), region = 101 }
 0x34d   :  { %1376 = vsyncpa [#allocation3], 1 }
 0x34e   :  { %1378 = vsyncpa [#allocation3 + $0x1], 1 }

</bundles_post_ra>
